<compile_context>
chip_gen: v7x
topology: tpu7x:2x2x1
jax: 0.10.0
libtpu: 0.0.40
codegen_flags: <defaults>
</compile_context>

<pallas_src>
import functools

import jax
import jax.numpy as jnp
from jax.experimental import pallas as pl
from jax.experimental.pallas import tpu as pltpu


def _conv_relu_kernel(w_ref, x_ref, o_ref, *, nb, x_cast_dtype):
    # w_ref: (Cout, Cin) weight (resident), x_ref: (nb, Cin, tile_hw) pixels,
    # o_ref: (nb, Cout, tile_hw).  Short static unroll over the batch block.
    w = w_ref[...]
    for b in range(nb):
        x = x_ref[b]
        if x_cast_dtype is not None:
            # Per-tile cast in VMEM (VPU) -- no extra HBM pass in the wrapper.
            x = x.astype(x_cast_dtype)
        acc = jnp.dot(w, x, preferred_element_type=jnp.float32)
        o_ref[b] = jnp.maximum(acc, 0.0).astype(o_ref.dtype)


def _vmem_capacity_bytes():
    try:
        return int(pltpu.get_tpu_info().vmem_capacity_bytes)
    except Exception:
        return 128 << 20  # conservative default (v5e/v6e)


@functools.partial(
    jax.jit,
    static_argnames=("tile_hw", "nb", "vmem_limit", "use_bf16", "out_dtype"),
)
def _conv_relu_impl(x_nchw, weight_oi, *, tile_hw, nb, vmem_limit, use_bf16, out_dtype):
    n, cin, h, w = x_nchw.shape
    cout = weight_oi.shape[0]
    hw = h * w

    # Free (metadata-only) reshape; x stays in its native dtype -> single HBM read.
    x3 = x_nchw.reshape(n, cin, hw)

    if use_bf16 and x3.dtype != jnp.bfloat16:
        x_cast_dtype = jnp.bfloat16          # cast per-tile inside the kernel
        wmat = weight_oi.astype(jnp.bfloat16)  # tiny; cast in wrapper is fine
    else:
        x_cast_dtype = None
        wmat = weight_oi.astype(x3.dtype)

    grid = (pl.cdiv(n, nb), pl.cdiv(hw, tile_hw))

    x_b = jnp.dtype(x3.dtype).itemsize
    w_b = jnp.dtype(wmat.dtype).itemsize
    o_b = jnp.dtype(out_dtype).itemsize
    cost = pl.CostEstimate(
        flops=2 * n * hw * cin * cout,
        transcendentals=0,
        bytes_accessed=(n * cin * hw * x_b
                        + cout * cin * w_b
                        + n * cout * hw * o_b),
    )

    kernel = functools.partial(_conv_relu_kernel, nb=nb, x_cast_dtype=x_cast_dtype)

    out3 = pl.pallas_call(
        kernel,
        out_shape=jax.ShapeDtypeStruct((n, cout, hw), out_dtype),
        grid_spec=pltpu.PrefetchScalarGridSpec(
            num_scalar_prefetch=0,
            grid=grid,
            in_specs=[
                # Full (small) weight, resident every step (constant index_map
                # -> DMA'd only once).
                pl.BlockSpec((cout, cin), lambda b, s: (0, 0)),
                # nb batch elements, one spatial tile.
                pl.BlockSpec((nb, cin, tile_hw), lambda b, s: (b, 0, s)),
            ],
            out_specs=pl.BlockSpec((nb, cout, tile_hw), lambda b, s: (b, 0, s)),
        ),
        compiler_params=pltpu.CompilerParams(
            dimension_semantics=("parallel", "parallel"),
            vmem_limit_bytes=vmem_limit,
        ),
        cost_estimate=cost,
    )(wmat, x3)

    return out3.reshape(n, cout, h, w)


def conv_relu(x_nchw, weight_oi, *, use_bf16=False, out_dtype=None, tile_hw_max=None):
    """1x1 conv (no bias) + ReLU, NCHW in / NCHW out (matches PyTorch ConvRelu).

    x_nchw:    (N, Cin, H, W)
    weight_oi: (Cout, Cin)   -- squeezed nn.Conv2d weight (Cout, Cin, 1, 1)
    use_bf16:  opt-in bf16 MXU inputs (default False = f32 parity with PyTorch)
    out_dtype: output dtype (default: x dtype); pass bf16 to halve writeback.
    """
    n, cin, h, w = x_nchw.shape
    cout = weight_oi.shape[0]
    hw = h * w
    out_dtype = jnp.dtype(x_nchw.dtype) if out_dtype is None else jnp.dtype(out_dtype)

    # Generation-aware VMEM budget / tile cap (v7x: 64 MiB VMEM; v5e/v6e: 128 MiB).
    vmem_cap = _vmem_capacity_bytes()
    vmem_budget = min(vmem_cap * 3 // 4, 100 << 20)   # ~48 MiB v7x, ~96 MiB v5e/v6e
    if tile_hw_max is None:
        tile_hw_max = 2048 if vmem_cap <= (64 << 20) else 8192

    # Lane-dense spatial tile (multiple of 128); no padding -- Pallas masks the
    # final partial block (safe: contraction is over Cin, never over HW).
    tile_hw = min(tile_hw_max, pl.cdiv(hw, 128) * 128)
    spatial_tiles = pl.cdiv(hw, tile_hw)

    # v7x megacore: make sure both TensorCores get work when N == 1.
    if n == 1 and spatial_tiles == 1 and hw > 128:
        tile_hw = pl.cdiv(pl.cdiv(hw, 2), 128) * 128
        spatial_tiles = pl.cdiv(hw, tile_hw)

    # Block several batch elements per step when the spatial extent is small,
    # but keep >= 2 grid steps along a "parallel" axis when possible.
    if spatial_tiles == 1:
        nb = max(1, min(n, tile_hw_max // tile_hw, 8))
        if n >= 2 and pl.cdiv(n, nb) < 2:
            nb = pl.cdiv(n, 2)
    else:
        nb = 1

    x_b = jnp.dtype(x_nchw.dtype).itemsize
    w_b = 2 if use_bf16 else x_b
    o_b = out_dtype.itemsize

    def vmem_needed(nb_, tile_):
        # Double-buffered x / out tiles + (double-buffered) resident weight.
        return 2 * nb_ * tile_ * (cin * x_b + cout * o_b) + 2 * cout * cin * w_b

    # Shrink batch block / tile until it fits this generation's VMEM budget.
    while vmem_needed(nb, tile_hw) > vmem_budget and nb > 1:
        nb = max(1, nb // 2)
    while vmem_needed(nb, tile_hw) > vmem_budget and tile_hw > 128:
        tile_hw = max(128, (tile_hw // 2) // 128 * 128)

    vmem_limit = int(max(16 << 20, min(vmem_needed(nb, tile_hw) + (4 << 20), vmem_budget)))

    return _conv_relu_impl(
        x_nchw, weight_oi,
        tile_hw=int(tile_hw), nb=int(nb), vmem_limit=vmem_limit,
        use_bf16=bool(use_bf16), out_dtype=out_dtype,
    )


def _reference(x_nchw, weight_oi):
    # Pure-JAX reference: 1x1 conv == einsum over channels, then ReLU.
    y = jnp.einsum("nchw,oc->nohw", x_nchw, weight_oi,
                   precision=jax.lax.Precision.HIGHEST)
    return jnp.maximum(y, 0.0)


if __name__ == "__main__":
    key = jax.random.PRNGKey(0)
    k_x, k_w = jax.random.split(key)

    N, Cin, H, W = 2, 4, 16, 16
    Cout = 8

    x = jax.random.normal(k_x, (N, Cin, H, W), dtype=jnp.float32)
    # Deterministic "Kaiming-ish" init for Conv2d weight (Cout, Cin, 1, 1), squeezed.
    weight = jax.random.normal(k_w, (Cout, Cin), dtype=jnp.float32) * (2.0 / Cin) ** 0.5

    # Default path: native f32 operands end to end (PyTorch Conv2d parity).
    out = jax.block_until_ready(conv_relu(x, weight))
    assert out.shape == (N, Cout, H, W)
    ref = _reference(x, weight)
    # Tolerance is robust to the MXU's internal precision mode for f32 matmul.
    assert jnp.allclose(out, ref, atol=2e-2, rtol=2e-2), "mismatch vs f32 reference"

    # Opt-in bf16 fast path (x cast per-tile inside the kernel, no wrapper pass).
    out_bf16 = jax.block_until_ready(conv_relu(x, weight, use_bf16=True))
    ref_bf16 = _reference(x.astype(jnp.bfloat16).astype(jnp.float32),
                          weight.astype(jnp.bfloat16).astype(jnp.float32))
    assert jnp.allclose(out_bf16, ref_bf16, atol=2e-2, rtol=2e-2), "mismatch vs bf16 reference"

    print("KERNEL_OK")
</pallas_src>

<mosaic_0001>
module attributes {stable_mosaic.version = 11 : i64} {
  func.func @_conv_relu_kernel(%arg0: i32, %arg1: i32, %arg2: memref<8x4xf32, #tpu.memory_space<vmem>>, %arg3: memref<1x4x256xf32, #tpu.memory_space<vmem>>, %arg4: memref<1x8x256xf32, #tpu.memory_space<vmem>>) attributes {dimension_semantics = [#tpu.dimension_semantics<parallel>, #tpu.dimension_semantics<parallel>], iteration_bounds = array<i64: 2, 1>, scalar_prefetch = 0 : i64, scratch_operands = 0 : i64, tpu.core_type = #tpu.core_type<tc>, window_params = [{pipeline_mode = #tpu.pipeline_mode<synchronous>, transform_indices = @transform_0, window_bounds = array<i64: 8, 4>}, {transform_indices = @transform_1, window_bounds = array<i64: 1, 4, 256>}, {transform_indices = @transform_2, window_bounds = array<i64: 1, 8, 256>}]} {
    %c0 = arith.constant 0 : index
    %c0_0 = arith.constant 0 : index
    %0 = vector.load %arg2[%c0, %c0_0] : memref<8x4xf32, #tpu.memory_space<vmem>>, vector<8x4xf32>
    %c0_1 = arith.constant 0 : index
    %c0_2 = arith.constant 0 : index
    %c0_3 = arith.constant 0 : index
    %1 = vector.load %arg3[%c0_1, %c0_2, %c0_3] : memref<1x4x256xf32, #tpu.memory_space<vmem>>, vector<1x4x256xf32>
    %2 = vector.shape_cast %1 : vector<1x4x256xf32> to vector<4x256xf32>
    %cst = arith.constant dense<0.000000e+00> : vector<8x256xf32>
    %3 = tpu.matmul %0, %2, %cst {dimension_numbers = #tpu.dot_dimension_numbers<[1], [0], [0], [1], [0, 0, 1, 1], [], []>} : vector<8x4xf32>, vector<4x256xf32>, vector<8x256xf32> -> vector<8x256xf32>
    %cst_4 = arith.constant 0.000000e+00 : f32
    %4 = vector.broadcast %cst_4 : f32 to vector<8x256xf32>
    %5 = arith.maximumf %3, %4 : vector<8x256xf32>
    %c0_5 = arith.constant 0 : index
    %c0_6 = arith.constant 0 : index
    %c0_7 = arith.constant 0 : index
    %6 = vector.load %arg4[%c0_5, %c0_6, %c0_7] : memref<1x8x256xf32, #tpu.memory_space<vmem>>, vector<1x8x256xf32>
    %7 = vector.shape_cast %6 : vector<1x8x256xf32> to vector<8x256xf32>
    %8 = vector.shape_cast %5 : vector<8x256xf32> to vector<1x8x256xf32>
    tpu.vector_store %arg4[%c0_5, %c0_6, %c0_7], %8 {strides = array<i32>} : memref<1x8x256xf32, #tpu.memory_space<vmem>>, vector<1x8x256xf32>,
    return
  }
  func.func @transform_0(%arg0: i32, %arg1: i32) -> (i32, i32) {
    %c0_i32 = arith.constant 0 : i32
    %c0_i32_0 = arith.constant 0 : i32
    %c0_i32_1 = arith.constant 0 : i32
    return %c0_i32, %c0_i32_0 : i32, i32
  }
  func.func @transform_1(%arg0: i32, %arg1: i32) -> (i32, i32, i32) {
    %c0_i32 = arith.constant 0 : i32
    %c0_i32_0 = arith.constant 0 : i32
    return %arg0, %c0_i32, %arg1 : i32, i32, i32
  }
  func.func @transform_2(%arg0: i32, %arg1: i32) -> (i32, i32, i32) {
    %c0_i32 = arith.constant 0 : i32
    %c0_i32_0 = arith.constant 0 : i32
    return %arg0, %c0_i32, %arg1 : i32, i32, i32
  }
}

</mosaic_0001>

<bundles_post_ra>
// kernel: _conv_relu_impl.1
= control target key start
LH: loop header
LB: loop body
LE: loop exit
PB: predicated region body
PF: predicated region fallthrough
CT: control target
= control target key end

     0   :  { %s440_s9 = smov 0   ;;  %s442_s10 = smov 0   ;;  %s473_s0 = inlined_call_operand.vmem [shape: f32[8,4], index: 0, kind: input, shape index: {}]   ;;  %s474_s1 = inlined_call_operand.vmem [shape: f32[2,4,256], index: 1, kind: input, shape index: {}]   ;;  %s475_s2 = inlined_call_operand.vmem [shape: f32[2,8,256], index: 2, kind: output, shape index: {}]  }
   0x1   :  { %s444_s11 = smov 0  }
   0x2 LB: > { %s24_s12 = sadd.s32 1, %s418_s10  ;;  %p362_p0 = scmp.ge.s32.totalorder %s422_s11, 1  ;;  %s422_s11 = sphi %s444_s11, %s12_s11   ;;  %s418_s10 = sphi %s442_s10, %s477_s10   ;;  %s414_s9 = sphi %s440_s9, %s476_s9  }
   0x3   : > { %p26_p1 = scmp.ge.s32.totalorder %s24_s12, 2  ;;  %p133_p2 = scmp.lt.s32.totalorder %s422_s11, 3 }
   0x5   : > { %s479_s12 = smov (%p26_p1, %s24_s12), 0  ;;  %p134_p3 = pnand %p362_p0, %p133_p2 }
   0x6   : > { %p164_p4 = scmp.lt.s32.totalorder (!%p134_p3), %s414_s9, 1  ;;  %v424_v0 = vmov (!%p134_p3), 0.0   ;;  %vm191_vm0 = vcmask (!%p134_p3), 1043456   ;;  %v183_v3 = vld [vmem:[%s473_s0] sm:$0xff] (!%p134_p3)  ;;  %vm187_vm1 = vcmask (!%p134_p3), 31744  }
   0x7   : > { %137 = sbr.rel (%p134_p3) target bundleno = 238 (0xee), region = 28  ;;  %260 = vmatprep.mubr.f32.mxu0 (!%p134_p3), %v424_v0 }
   0xe   : > { %s481_s9 = smov (!%p164_p4, %s414_s9), 1 }
   0xf   : > { %s372_s13 = sshll.u32 %s481_s9, 3  ;;  %s373_s19 = sshll.u32 %s481_s9, 4 }
  0x10   : > { %s171_s16 = scalar_lea.vmem %s474_s1, %s372_s13  ;;  %s181_s22 = scalar_lea.vmem %s475_s2, %s373_s19 }
  0x11   : > { %v184_v1 = vld [vmem:[%s171_s16] sm:$0xff] }
  0x12   : > { %v186_v2 = vcombine.high %v184_v1, %v184_v1 }
  0x14   : > { %367 = vmatprep.subr.msk.mxu0 %vm191_vm0, %v186_v2 }
  0x15   : > { %368 = vmatpush1.msk.msra.mxu0 %vm191_vm0, %v184_v1 }
  0x16   : > { %369 = vmatmul.mubr.msk.f32.vlgmr.msra.gmra.mrb[0].mxu0 %vm187_vm1, %v183_v3 }
  0xe9   : > { %v262_v4 = vpop.f32.mrb[0].mxu0 }
  0xea   : > { %v267_v5 = vmax.f32 %v262_v4, 0.0  ;;  %v264_v6 = vpop.f32.mrb[1].mxu0 }
  0xeb   : > { %v268_v7 = vmax.f32 %v264_v6, 0.0 }
  0xec   : > { %269 = vst [vmem:[%s181_s22] sm:$0xff] %v267_v5 }
  0xed   : > { %270 = vst [vmem:[%s181_s22 + $0x8] sm:$0xff] %v268_v7 }
  0xee PF: > { %s12_s11 = sadd.s32 1, %s422_s11   ;;  %s476_s9 = smov %s418_s10 }
  0xef   : > { %p9_p5 = scmp.ge.s32.totalorder %s12_s11, 4   ;;  %s477_s10 = smov %s479_s12 }
  0xf1   :  { %11 = sbr.rel (!%p9_p5) target bundleno = 2 (0x2), region = 58 }

</bundles_post_ra>
